<compile_context>
chip_gen: v7x
topology: tpu7x:2x2x1
jax: 0.10.0
libtpu: 0.0.40
codegen_flags: <defaults>
</compile_context>

<pallas_src>
import functools

import jax
import jax.numpy as jnp
from jax.experimental import pallas as pl
from jax.experimental.pallas import tpu as pltpu

_LANE = 128


def _cdiv(a, b):
    return -(-a // b)


def _round_up(n, m):
    return ((n + m - 1) // m) * m


def _vmem_capacity_bytes():
    try:
        info = pltpu.get_tpu_info()
        cap = int(getattr(info, "vmem_capacity_bytes", 0))
        if cap > 0:
            return cap
    except Exception:
        pass
    return 64 * 1024 * 1024  # conservative fallback (v7x-sized)


def _budgets():
    """(tile budget for tiles + resident blocks, hard cap for vmem_limit)."""
    cap = _vmem_capacity_bytes()
    if cap <= 96 * 1024 * 1024:           # v7x-class: 64 MiB per TensorCore
        tile_budget = 30 * 1024 * 1024
    else:                                  # v5e / v6e: 128 MiB
        tile_budget = 88 * 1024 * 1024
    hard_cap = (cap * 3) // 4
    return tile_budget, hard_cap


def _vmem_limit(needed, hard_cap):
    return int(min(max(needed + (12 << 20), 16 << 20), hard_cap))


def _plan_tiles(ab, cd, itemsize, *, resident_blocks):
    """Choose (tm, nm, tk, nk).

    resident_blocks = number of (tm, ab) f32 blocks resident per row block
    (output/accumulator + double-buffered target, as applicable).
    Rows are split only when the resident blocks would not fit the budget.
    """
    tile_budget, _ = _budgets()
    cd128 = _round_up(cd, _LANE)

    tm, nm = ab, 1

    def resident(t):
        return resident_blocks * t * ab * 4

    def min_tiles(t, n):
        cols = ab if n == 1 else t + ab
        return 2 * cols * _LANE * itemsize   # double-buffered minimal K tile

    while (resident(tm) + min_tiles(tm, nm) > tile_budget
           and tm % 2 == 0 and (tm // 2) % 8 == 0 and tm > 8):
        tm //= 2
        nm *= 2
    # If it still does not fit (very odd ab), proceed; the compiler may spill.

    cols = ab if nm == 1 else tm + ab
    avail = max(tile_budget - resident(tm), 2 * cols * _LANE * itemsize)
    tk_max = (avail // (2 * cols * itemsize)) // _LANE * _LANE
    tk_max = max(_LANE, tk_max)
    tk_max = min(tk_max, cd128)
    # Balance K tiles so the tail tile is not tiny (review item 1).
    nk = _cdiv(cd128, tk_max)
    tk = _round_up(_cdiv(cd128, nk), _LANE)
    nk = _cdiv(cd, tk)
    return tm, nm, tk, nk


def _resolve_mxu_dtype(mxu_dtype, ab, feats_dtype):
    if mxu_dtype == "auto":
        # bf16 operands (f32 accumulation) once the gram is big enough to be
        # MXU-bound in f32; exact f32 otherwise.
        return jnp.bfloat16 if (ab >= 256 and feats_dtype == jnp.float32) else None
    return mxu_dtype


def _partial_gram(fl, fr, k, *, cd, tk, mxu_dtype, shared):
    """Partial product fl @ fr^T (f32 accumulate) with tail-column masking.

    fl: (tm, tk) rows of F; fr: (rows_r, tk) rows of F (same array when
    shared=True).  Columns with global index >= cd are zero-masked (the
    out-of-bounds part of a partial block is undefined); masking only emits
    code when cd is not a multiple of tk.
    """
    if cd % tk != 0:
        limit = cd - k * tk            # >= tk on all but the last K step
        fl = jnp.where(
            jax.lax.broadcasted_iota(jnp.int32, fl.shape, 1) < limit, fl, 0.0)
        if not shared:
            fr = jnp.where(
                jax.lax.broadcasted_iota(jnp.int32, fr.shape, 1) < limit, fr, 0.0)
    if mxu_dtype is not None and fl.dtype != mxu_dtype:
        fl = fl.astype(mxu_dtype)      # in-kernel cast: no extra HBM traffic
        if not shared:
            fr = fr.astype(mxu_dtype)
    if shared:
        fr = fl
    return jax.lax.dot_general(        # F @ F^T with no explicit transpose
        fl, fr, (((1,), (1,)), ((), ())), preferred_element_type=jnp.float32)


# ---------------------------------------------------------------------------
# Kernel 1: standalone gram matrix  G = (F @ F^T) / (a*b*c*d)
# Grid = (nm, nk); the (tm, ab) f32 output block is resident across the K
# reduction and is itself the accumulator.
# ---------------------------------------------------------------------------
def _gram_kernel(*refs, nm, scale, cd, tk, mxu_dtype):
    if nm == 1:
        feat_ref, g_ref = refs
        lhs_ref = rhs_ref = feat_ref
    else:
        lhs_ref, rhs_ref, g_ref = refs
    shared = nm == 1
    k = pl.program_id(1)

    @pl.when(k == 0)
    def _():
        g_ref[...] = jnp.zeros_like(g_ref)

    fl = lhs_ref[...]
    fr = fl if shared else rhs_ref[...]
    g_ref[...] += _partial_gram(fl, fr, k, cd=cd, tk=tk,
                                mxu_dtype=mxu_dtype, shared=shared)

    @pl.when(k == pl.num_programs(1) - 1)
    def _():
        g_ref[...] = g_ref[...] * scale


def gram_matrix_pallas(x, *, mxu_dtype="auto"):
    a, b, c, d = x.shape
    ab, cd = a * b, c * d
    scale = 1.0 / float(a * b * c * d)

    feats = x.reshape(ab, cd)          # metadata-only reshape; no pad, no astype
    mxu_dtype = _resolve_mxu_dtype(mxu_dtype, ab, feats.dtype)
    itemsize = feats.dtype.itemsize

    # resident per row block: output block (double-buffered).
    tm, nm, tk, nk = _plan_tiles(ab, cd, itemsize, resident_blocks=2)
    _, hard_cap = _budgets()
    cols = ab if nm == 1 else tm + ab
    needed = 2 * tm * ab * 4 + 2 * cols * tk * itemsize

    kernel = functools.partial(_gram_kernel, nm=nm, scale=scale, cd=cd, tk=tk,
                               mxu_dtype=mxu_dtype)
    if nm == 1:
        in_specs = [pl.BlockSpec((tm, tk), lambda m, k: (0, k))]
        operands = (feats,)
        feat_bytes = ab * cd * itemsize
    else:
        in_specs = [pl.BlockSpec((tm, tk), lambda m, k: (m, k)),
                    pl.BlockSpec((ab, tk), lambda m, k: (0, k))]
        operands = (feats, feats)
        feat_bytes = (nm + 1) * ab * cd * itemsize

    return pl.pallas_call(
        kernel,
        out_shape=jax.ShapeDtypeStruct((ab, ab), jnp.float32),
        grid_spec=pltpu.PrefetchScalarGridSpec(
            num_scalar_prefetch=0,
            grid=(nm, nk),
            in_specs=in_specs,
            out_specs=pl.BlockSpec((tm, ab), lambda m, k: (m, 0)),
        ),
        compiler_params=pltpu.CompilerParams(
            dimension_semantics=("parallel", "arbitrary"),
            vmem_limit_bytes=_vmem_limit(needed, hard_cap)),
        cost_estimate=pl.CostEstimate(
            flops=2 * ab * ab * cd,
            transcendentals=0,
            bytes_accessed=feat_bytes + ab * ab * 4),
    )(*operands)


# ---------------------------------------------------------------------------
# Kernel 2 (fused): style loss = mean((gram(x) - target_gram)^2)
# The input's gram lives only in a VMEM scratch accumulator; at the last K
# step each row block is compared against the resident target-gram block and
# reduced to a per-row-block partial loss (summed in the wrapper).
# ---------------------------------------------------------------------------
def _gram_mse_kernel(*refs, nm, scale, inv_n, cd, tk, mxu_dtype):
    if nm == 1:
        feat_ref, tgt_ref, loss_ref, acc_ref = refs
        lhs_ref = rhs_ref = feat_ref
    else:
        lhs_ref, rhs_ref, tgt_ref, loss_ref, acc_ref = refs
    shared = nm == 1
    k = pl.program_id(1)

    @pl.when(k == 0)
    def _():
        acc_ref[...] = jnp.zeros_like(acc_ref)

    fl = lhs_ref[...]
    fr = fl if shared else rhs_ref[...]
    acc_ref[...] += _partial_gram(fl, fr, k, cd=cd, tk=tk,
                                  mxu_dtype=mxu_dtype, shared=shared)

    @pl.when(k == pl.num_programs(1) - 1)
    def _():
        diff = acc_ref[...] * scale - tgt_ref[...].astype(jnp.float32)
        partial = jnp.sum(diff * diff) * inv_n
        loss_ref[...] = jnp.full(loss_ref.shape, partial, jnp.float32)


def style_loss_pallas(x, target_gram, *, mxu_dtype="auto"):
    a, b, c, d = x.shape
    ab, cd = a * b, c * d
    scale = 1.0 / float(a * b * c * d)
    inv_n = 1.0 / float(ab * ab)

    feats = x.reshape(ab, cd)
    mxu_dtype = _resolve_mxu_dtype(mxu_dtype, ab, feats.dtype)
    itemsize = feats.dtype.itemsize
    target_gram = target_gram.astype(jnp.float32)

    # resident per row block: f32 accumulator + double-buffered target block.
    tm, nm, tk, nk = _plan_tiles(ab, cd, itemsize, resident_blocks=3)
    _, hard_cap = _budgets()
    cols = ab if nm == 1 else tm + ab
    needed = 3 * tm * ab * 4 + 2 * cols * tk * itemsize

    kernel = functools.partial(_gram_mse_kernel, nm=nm, scale=scale,
                               inv_n=inv_n, cd=cd, tk=tk, mxu_dtype=mxu_dtype)
    tgt_spec = pl.BlockSpec((tm, ab), lambda m, k: (m, 0))
    if nm == 1:
        in_specs = [pl.BlockSpec((tm, tk), lambda m, k: (0, k)), tgt_spec]
        operands = (feats, target_gram)
        feat_bytes = ab * cd * itemsize
    else:
        in_specs = [pl.BlockSpec((tm, tk), lambda m, k: (m, k)),
                    pl.BlockSpec((ab, tk), lambda m, k: (0, k)),
                    tgt_spec]
        operands = (feats, feats, target_gram)
        feat_bytes = (nm + 1) * ab * cd * itemsize

    out = pl.pallas_call(
        kernel,
        out_shape=jax.ShapeDtypeStruct((nm, 8, _LANE), jnp.float32),
        grid_spec=pltpu.PrefetchScalarGridSpec(
            num_scalar_prefetch=0,
            grid=(nm, nk),
            in_specs=in_specs,
            out_specs=pl.BlockSpec((1, 8, _LANE), lambda m, k: (m, 0, 0)),
            scratch_shapes=[pltpu.VMEM((tm, ab), jnp.float32)],
        ),
        compiler_params=pltpu.CompilerParams(
            dimension_semantics=("parallel", "arbitrary"),
            vmem_limit_bytes=_vmem_limit(needed, hard_cap)),
        cost_estimate=pl.CostEstimate(
            flops=2 * ab * ab * cd,
            transcendentals=0,
            bytes_accessed=feat_bytes + ab * ab * 4 + nm * 8 * _LANE * 4),
    )(*operands)
    # Each row block already contributed its share of the mean.
    return jnp.sum(out[:, 0, 0])


# ---------------------------------------------------------------------------
# Module-equivalent wrapper (nn.Module semantics: forward returns the input
# unchanged and stashes the scalar loss on self.loss).
# ---------------------------------------------------------------------------
class StyleLoss:
    def __init__(self, target_feature, *, mxu_dtype="auto"):
        self._mxu_dtype = mxu_dtype
        # self.target = gram_matrix(target_feature).detach()
        self.target = gram_matrix_pallas(target_feature, mxu_dtype=mxu_dtype)
        self.loss = None

    def forward(self, x):
        # Fused gram + MSE: the input's gram never leaves VMEM.
        self.loss = style_loss_pallas(x, self.target, mxu_dtype=self._mxu_dtype)
        return x

    __call__ = forward


# ---------------------------------------------------------------------------
# Pure-JAX reference for the correctness check.
# ---------------------------------------------------------------------------
def _gram_ref(t):
    a, b, c, d = t.shape
    f = t.reshape(a * b, c * d).astype(jnp.float32)
    g = jnp.matmul(f, f.T, precision=jax.lax.Precision.HIGHEST)
    return g / float(a * b * c * d)


if __name__ == "__main__":
    key = jax.random.PRNGKey(0)
    k_tgt, k_in = jax.random.split(key)

    # small shapes consistent with a conv feature map: (N, C, H, W)
    target_feature = jax.random.normal(k_tgt, (2, 4, 16, 16), dtype=jnp.float32)
    x = jax.random.normal(k_in, (2, 4, 16, 16), dtype=jnp.float32)

    module = StyleLoss(target_feature)
    out = module(x)

    out = jax.block_until_ready(out)
    loss = jax.block_until_ready(module.loss)
    g_kernel = jax.block_until_ready(gram_matrix_pallas(x))

    # reference check (small shapes keep the kernels on the exact f32 path)
    g_ref = _gram_ref(x)
    t_ref = _gram_ref(target_feature)
    loss_ref = jnp.mean((g_ref - t_ref) ** 2)

    assert out.shape == x.shape and jnp.allclose(out, x), "forward must return input"
    assert jnp.allclose(module.target, t_ref, rtol=1e-4, atol=1e-6)
    assert jnp.allclose(g_kernel, g_ref, rtol=1e-4, atol=1e-6)
    assert jnp.allclose(loss, loss_ref, rtol=1e-4, atol=1e-6), (loss, loss_ref)

    print("KERNEL_OK")
</pallas_src>

<mosaic_0001>
module attributes {stable_mosaic.version = 11 : i64} {
  func.func @_gram_kernel(%arg0: i32, %arg1: i32, %arg2: memref<8x256xf32, #tpu.memory_space<vmem>>, %arg3: memref<8x8xf32, #tpu.memory_space<vmem>>) attributes {dimension_semantics = [#tpu.dimension_semantics<parallel>, #tpu.dimension_semantics<arbitrary>], iteration_bounds = array<i64: 1, 1>, scalar_prefetch = 0 : i64, scratch_operands = 0 : i64, tpu.core_type = #tpu.core_type<tc>, window_params = [{transform_indices = @transform_0, window_bounds = array<i64: 8, 256>}, {transform_indices = @transform_1, window_bounds = array<i64: 8, 8>}]} {
    %c0_i32 = arith.constant 0 : i32
    %0 = arith.cmpi eq, %arg1, %c0_i32 : i32
    %1 = arith.extui %0 : i1 to i32
    %c0_i32_0 = arith.constant 0 : i32
    %2 = arith.cmpi ne, %1, %c0_i32_0 : i32
    scf.if %2 {
      %cst_8 = arith.constant 0.000000e+00 : f32
      %11 = vector.broadcast %cst_8 : f32 to vector<8x8xf32>
      %c0_9 = arith.constant 0 : index
      %c0_10 = arith.constant 0 : index
      %12 = vector.load %arg3[%c0_9, %c0_10] : memref<8x8xf32, #tpu.memory_space<vmem>>, vector<8x8xf32>
      tpu.vector_store %arg3[%c0_9, %c0_10], %11 {strides = array<i32>} : memref<8x8xf32, #tpu.memory_space<vmem>>, vector<8x8xf32>,
    } else {
    }
    %c0 = arith.constant 0 : index
    %c0_1 = arith.constant 0 : index
    %3 = vector.load %arg2[%c0, %c0_1] : memref<8x256xf32, #tpu.memory_space<vmem>>, vector<8x256xf32>
    %c0_2 = arith.constant 0 : index
    %c0_3 = arith.constant 0 : index
    %4 = vector.load %arg3[%c0_2, %c0_3] : memref<8x8xf32, #tpu.memory_space<vmem>>, vector<8x8xf32>
    %cst = arith.constant dense<0.000000e+00> : vector<8x8xf32>
    %5 = tpu.matmul %3, %3, %cst {dimension_numbers = #tpu.dot_dimension_numbers<[1], [1], [0], [0], [0, 0, 1, 0], [], []>} : vector<8x256xf32>, vector<8x256xf32>, vector<8x8xf32> -> vector<8x8xf32>
    %6 = arith.addf %4, %5 : vector<8x8xf32>
    %c0_4 = arith.constant 0 : index
    %c0_5 = arith.constant 0 : index
    %7 = vector.load %arg3[%c0_4, %c0_5] : memref<8x8xf32, #tpu.memory_space<vmem>>, vector<8x8xf32>
    tpu.vector_store %arg3[%c0_4, %c0_5], %6 {strides = array<i32>} : memref<8x8xf32, #tpu.memory_space<vmem>>, vector<8x8xf32>,
    %c0_i32_6 = arith.constant 0 : i32
    %8 = arith.cmpi eq, %arg1, %c0_i32_6 : i32
    %9 = arith.extui %8 : i1 to i32
    %c0_i32_7 = arith.constant 0 : i32
    %10 = arith.cmpi ne, %9, %c0_i32_7 : i32
    scf.if %10 {
      %c0_8 = arith.constant 0 : index
      %c0_9 = arith.constant 0 : index
      %11 = vector.load %arg3[%c0_8, %c0_9] : memref<8x8xf32, #tpu.memory_space<vmem>>, vector<8x8xf32>
      %cst_10 = arith.constant 4.8828125E-4 : f32
      %12 = vector.broadcast %cst_10 : f32 to vector<8x8xf32>
      %13 = arith.mulf %11, %12 : vector<8x8xf32>
      %c0_11 = arith.constant 0 : index
      %c0_12 = arith.constant 0 : index
      %14 = vector.load %arg3[%c0_11, %c0_12] : memref<8x8xf32, #tpu.memory_space<vmem>>, vector<8x8xf32>
      tpu.vector_store %arg3[%c0_11, %c0_12], %13 {strides = array<i32>} : memref<8x8xf32, #tpu.memory_space<vmem>>, vector<8x8xf32>,
    } else {
    }
    return
  }
  func.func @transform_0(%arg0: i32, %arg1: i32) -> (i32, i32) {
    %c0_i32 = arith.constant 0 : i32
    %c0_i32_0 = arith.constant 0 : i32
    return %c0_i32, %arg1 : i32, i32
  }
  func.func @transform_1(%arg0: i32, %arg1: i32) -> (i32, i32) {
    %c0_i32 = arith.constant 0 : i32
    %c0_i32_0 = arith.constant 0 : i32
    return %arg0, %c0_i32 : i32, i32
  }
}

</mosaic_0001>

<bundles_post_ra>
// kernel: tpu_custom_call.1
= control target key start
LH: loop header
LB: loop body
LE: loop exit
PB: predicated region body
PF: predicated region fallthrough
CT: control target
= control target key end

     0   :  { %6 = vsyncpa [#allocation3], 0  ;;  %s215_s0 = inlined_call_operand.hbm [shape: f32[8,256], index: 0, kind: input, shape index: {}]   ;;  %s216_s1 = inlined_call_operand.hbm [shape: f32[8,8], index: 1, kind: output, shape index: {}]  }
   0x1   :  { %7 = vsyncpa [#allocation4], 0  ;;  %s175_s6 = smov [#allocation2]   ;;  %s127_s10 = scalar_lea.hbm %s215_s0, 256 }
   0x2   :  { %s14_s7 = sshll.u32 %s175_s6, 4  ;;  %p128_p0 = scmp.ne.s32.totalorder %s215_s0, %s127_s10  ;;  %s15_s7 = int_to_ptr.vmem [resolvable:$true] %s14_s7 }
   0x3   :  { %p131_p1 = scmp.lt.u32.totalorder %s127_s10, %s215_s0 }
   0x5   :  { %p133_p2 = pnand %p131_p1, %p128_p0 }
   0x7   :  { %136 = shalt.err (!%p133_p2)
}
   0x8   :  { %s137_s15 = scalar_lea.vmem %s15_s7, 256  ;;  %p142_p4 = scmp.lt.s32.totalorder %s15_s7, %s15_s7 }
   0x9   :  { %p138_p3 = scmp.ne.s32.totalorder %s15_s7, %s137_s15  ;;  %p143_p5 = scmp.lt.s32.totalorder %s137_s15, %s137_s15 }
   0xb   :  { %p144_p6 = por %p143_p5, %p142_p4 }
   0xd   :  { %p145_p7 = pnand %p144_p6, %p138_p3 }
   0xf   :  { %148 = shalt.err (!%p145_p7)
}
  0x10   :  { %17 = dma.hbm_to_vmem [thread:$0]  %s215_s0, 256, %s15_s7, [#allocation3]  }
  0x11   :  { %171 = dma.done.wait [#allocation3], 256  }
  0x12   :  { %172 = vsyncadd [#allocation3], 4294967040  ;;  %vm25_vm0 = vcmask 64512   ;;  %v176_v0 = vmov 0.0   ;;  %v28_v1 = vld [vmem:[#allocation2 + $0x8] sm:$0xff]  ;;  %v27_v2 = vld [vmem:[#allocation2] sm:$0xff] }
  0x13   :  { %26 = vst.msk [vmem:[#allocation5] sm:$0xff] %vm25_vm0, %v176_v0  ;;  %30 = vmatprep.subr.mxu0 %v28_v1  ;;  %94 = vmatprep.mubr.f32.mxu0 %v28_v1  ;;  %s177_s18 = smov [#allocation5]  }
  0x14   :  { %31 = vmatpush1.xpose.msra.mxu0 %v27_v2  ;;  %s115_s0 = sshll.u32 %s177_s18, 4  ;;  %s116_s0 = int_to_ptr.vmem [resolvable:$true] %s115_s0 }
  0x15   :  { %s149_s19 = scalar_lea.vmem %s116_s0, 128  ;;  %p154_p9 = scmp.lt.s32.totalorder %s116_s0, %s116_s0 }
  0x16   :  { %p150_p8 = scmp.ne.s32.totalorder %s116_s0, %s149_s19  ;;  %p155_p10 = scmp.lt.s32.totalorder %s149_s19, %s149_s19 }
  0x17   :  { %95 = vmatmul.mubr.f32.vlgmr.msra.gmra.mrb[0].mxu0 %v27_v2 }
  0x18   :  { %p156_p11 = por %p155_p10, %p154_p9 }
  0x1a   :  { %v29_v3 = vld [vmem:[#allocation5] sm:$0xff]  ;;  %p157_p12 = pnand %p156_p11, %p150_p8 }
  0xea   :  { %v96_v4 = vpop.f32.mrb[0].mxu0 }
  0xeb   :  { %v100_v5 = vadd.f32 %v96_v4, %v29_v3  ;;  %v98_v6 = vpop.f32.mrb[1].mxu0 }
  0xed   :  { %102 = vst.msk [vmem:[#allocation5] sm:$0xff] %vm25_vm0, %v100_v5 }
  0xf4   :  { %v106_v7 = vld [vmem:[#allocation5] sm:$0xff] }
  0xf5   :  { %v107_v8 = vmul.f32 0.00048828125, %v106_v7 }
  0xf7   :  { %108 = vst.msk [vmem:[#allocation5] sm:$0xff] %vm25_vm0, %v107_v8 }
  0xf8   :  { %160 = shalt.err (!%p157_p12)
}
  0xf9   :  { %s161_s22 = scalar_lea.hbm %s216_s1, 128 }
  0xfa   :  { %p162_p13 = scmp.ne.s32.totalorder %s216_s1, %s161_s22  ;;  %p165_p0 = scmp.lt.u32.totalorder %s161_s22, %s216_s1 }
  0xfc   :  { %p167_p1 = pnand %p165_p0, %p162_p13 }
  0xfe   :  { %170 = shalt.err (!%p167_p1)
}
  0xff   :  { %118 = dma.vmem_to_hbm [thread:$0]  %s116_s0, 128, %s216_s1, [#allocation4]  }
 0x100   :  { %173 = dma.done.wait [#allocation4], 128  }
 0x101   :  { %174 = vsyncadd [#allocation4], 4294967168 }
 0x102   :  { %122 = vsyncpa [#allocation3], 1 }
 0x103   :  { %123 = vsyncpa [#allocation4], 1 }

</bundles_post_ra>
